<compile_context>
chip_gen: v5e
topology: v5e:2x2
jax: 0.10.0
libtpu: 0.0.40
codegen_flags: <defaults>
</compile_context>

<pallas_src>
import functools

import jax
import jax.numpy as jnp
from jax.experimental import pallas as pl
from jax.experimental.pallas import tpu as pltpu


def _round_up(a, b):
    return (a + b - 1) // b * b


def _default_vmem_limit_bytes():
    """Physical VMEM minus ~16 MiB headroom, capped at 100 MiB.

    v5e/v6e (128 MiB physical) -> 100 MiB; v7x (64 MiB physical) -> 48 MiB.
    """
    try:
        cap = int(pltpu.get_tpu_info().vmem_capacity_bytes)
    except Exception:
        cap = 64 * 1024 * 1024            # conservative (v7x-sized) fallback
    return int(max(min(cap - 16 * 1024 * 1024, 100 * 1024 * 1024),
                   32 * 1024 * 1024))


def _attention_block_kernel(g_ref, x_ref,
                            wg_ref, wx_ref,
                            bgx_ref, wp_ref, bp_ref,
                            out_ref, *, compute_dtype):
    # g_ref  : (1, F_g, TS)  native dtype     x_ref : (1, F_l, TS) native dtype
    # wg_ref : (F_int, F_g)  compute dtype    wx_ref: (F_int, F_l) compute dtype
    # bgx_ref: (F_int, 1) f32 (folded BN bias of W_g + W_x paths, pre-summed)
    # wp_ref : (F_int, 1) f32 (folded psi conv weights, as a column)
    # bp_ref : (1,)       f32 scalar in SMEM
    # out_ref: (1, F_l, TS)
    g = g_ref[0]                                        # (F_g, TS)
    x = x_ref[0]                                        # (F_l, TS)

    # 1x1 convs as channel matmuls on the MXU with f32 accumulation.  Cast the
    # streamed tiles to the compute dtype here (VPU, free in the mem-bound
    # regime) instead of in a separate wrapper pass.
    h = jnp.maximum(
        jnp.dot(wg_ref[...], g.astype(compute_dtype),
                preferred_element_type=jnp.float32)
        + jnp.dot(wx_ref[...], x.astype(compute_dtype),
                  preferred_element_type=jnp.float32)
        + bgx_ref[...],
        0.0)                                            # (F_int, TS) f32

    # psi projection: output width 1 -> keep it off the MXU.
    # VPU multiply + sublane reduction (XLU slot), sigmoid on the EUP.
    p = jnp.sum(h * wp_ref[...], axis=0, keepdims=True) + bp_ref[0]   # (1, TS)
    psi = jax.nn.sigmoid(p)

    # Final gating multiply on the unquantized (native-dtype) x.
    out_ref[0] = (x.astype(jnp.float32) * psi).astype(out_ref.dtype)


def _fold_bn(w, b, gamma, beta, mean, var, eps=1e-5):
    """Fold eval-mode BatchNorm into a 1x1 conv. w: (C_out, C_in), b: (C_out,)."""
    s = gamma / jnp.sqrt(var + eps)               # (C_out,)
    w_eff = w * s[:, None]
    b_eff = b * s + (beta - mean * s)
    return w_eff, b_eff


def attention_block(g, x, params, *,
                    compute_dtype=jnp.bfloat16,
                    max_tile_s=16384,
                    vmem_limit_bytes=None):
    """g: (N, F_g, H, W) NCHW, x: (N, F_l, H, W) NCHW -> (N, F_l, H, W)."""
    N, F_g, H, W = g.shape
    _, F_l, _, _ = x.shape
    F_int = params["wg"].shape[0]
    S = H * W
    out_dtype = x.dtype

    if vmem_limit_bytes is None:
        vmem_limit_bytes = _default_vmem_limit_bytes()

    # Fold BatchNorms (running-stat / eval semantics) into the 1x1 convs.
    wg_eff, bg_eff = _fold_bn(params["wg"], params["bg"],
                              params["bn_g_gamma"], params["bn_g_beta"],
                              params["bn_g_mean"], params["bn_g_var"])
    wx_eff, bx_eff = _fold_bn(params["wx"], params["bx"],
                              params["bn_x_gamma"], params["bn_x_beta"],
                              params["bn_x_mean"], params["bn_x_var"])
    wp_eff, bp_eff = _fold_bn(params["wp"], params["bp"],
                              params["bn_p_gamma"], params["bn_p_beta"],
                              params["bn_p_mean"], params["bn_p_var"])

    # NCHW kept as-is (no transposes, no dtype pass); flatten spatial.
    g3 = g.reshape(N, F_g, S)
    x3 = x.reshape(N, F_l, S)

    in_g_b = jnp.dtype(g.dtype).itemsize
    in_x_b = jnp.dtype(x.dtype).itemsize
    out_b = jnp.dtype(out_dtype).itemsize
    cmp_b = jnp.dtype(compute_dtype).itemsize

    # --- spatial tile size, derived from the VMEM limit -------------------
    # Resident weights / biases.
    weight_bytes = F_int * (F_g + F_l) * cmp_b + 2 * F_int * 4 + 256
    # Per spatial column: double-buffered streamed tiles + in-kernel casts +
    # f32 intermediates (matmul accumulations, h, psi row, out compute).
    per_col = (2 * (F_g * in_g_b + F_l * in_x_b)     # inputs, double-buffered
               + 2 * F_l * out_b                     # output, double-buffered
               + (F_g + F_l) * cmp_b                 # in-kernel dtype casts
               + 4 * (3 * F_int + F_l + 2))          # f32 intermediates
    headroom = 2 * 1024 * 1024
    budget = max(vmem_limit_bytes - weight_bytes - headroom, 128 * per_col)

    if S <= 128:
        ts = S                       # block == full dim satisfies lane rule
    else:
        ts = (budget // per_col) // 128 * 128
        ts = max(128, min(ts, max_tile_s, (S // 128) * 128))
        if N == 1:
            # Keep >= 2 spatial grid steps so both v7x TensorCores get work.
            half = _round_up(pl.cdiv(S, 2), 128)
            ts = max(128, min(ts, half))

    grid = (N, pl.cdiv(S, ts))

    # Weight / bias layouts for the kernel.
    wg_c = wg_eff.astype(compute_dtype)                       # (F_int, F_g)
    wx_c = wx_eff.astype(compute_dtype)                       # (F_int, F_l)
    bgx = (bg_eff + bx_eff).reshape(F_int, 1).astype(jnp.float32)
    wp_c = wp_eff.reshape(F_int, 1).astype(jnp.float32)       # column vector
    bp_s = bp_eff.reshape(1).astype(jnp.float32)              # SMEM scalar

    # Advisory cost estimate for the XLA scheduler.
    flops = int(2 * N * S * F_int * (F_g + F_l) + N * S * (4 * F_int + 3 * F_l))
    transcendentals = int(N * S)
    bytes_accessed = int(N * S * (F_g * in_g_b + F_l * in_x_b + F_l * out_b)
                         + weight_bytes)

    kernel = functools.partial(_attention_block_kernel,
                               compute_dtype=compute_dtype)
    wfull = lambda n, s: (0, 0)

    out_flat = pl.pallas_call(
        kernel,
        out_shape=jax.ShapeDtypeStruct((N, F_l, S), out_dtype),
        grid_spec=pltpu.PrefetchScalarGridSpec(
            num_scalar_prefetch=0,
            grid=grid,
            in_specs=[
                pl.BlockSpec((1, F_g, ts), lambda n, s: (n, 0, s)),
                pl.BlockSpec((1, F_l, ts), lambda n, s: (n, 0, s)),
                pl.BlockSpec((F_int, F_g), wfull),
                pl.BlockSpec((F_int, F_l), wfull),
                pl.BlockSpec((F_int, 1), wfull),
                pl.BlockSpec((F_int, 1), wfull),
                pl.BlockSpec(memory_space=pltpu.MemorySpace.SMEM),
            ],
            out_specs=pl.BlockSpec((1, F_l, ts), lambda n, s: (n, 0, s)),
        ),
        compiler_params=pltpu.CompilerParams(
            dimension_semantics=("parallel", "parallel"),
            vmem_limit_bytes=int(vmem_limit_bytes)),
        cost_estimate=pl.CostEstimate(flops=flops,
                                      transcendentals=transcendentals,
                                      bytes_accessed=bytes_accessed),
    )(g3, x3, wg_c, wx_c, bgx, wp_c, bp_s)

    return out_flat.reshape(N, F_l, H, W)


def _reference(g, x, params):
    """Plain-JAX reference of the PyTorch forward (eval-mode BN)."""
    def conv1x1_bn(inp, w, b, gamma, beta, mean, var, eps=1e-5):
        z = jnp.einsum('nchw,oc->nohw', inp, w) + b[None, :, None, None]
        s = gamma / jnp.sqrt(var + eps)
        return z * s[None, :, None, None] + (beta - mean * s)[None, :, None, None]

    g1 = conv1x1_bn(g, params["wg"], params["bg"], params["bn_g_gamma"],
                    params["bn_g_beta"], params["bn_g_mean"], params["bn_g_var"])
    x1 = conv1x1_bn(x, params["wx"], params["bx"], params["bn_x_gamma"],
                    params["bn_x_beta"], params["bn_x_mean"], params["bn_x_var"])
    h = jnp.maximum(g1 + x1, 0.0)
    p = conv1x1_bn(h, params["wp"], params["bp"], params["bn_p_gamma"],
                   params["bn_p_beta"], params["bn_p_mean"], params["bn_p_var"])
    psi = jax.nn.sigmoid(p)
    return x * psi


def make_params(key, F_g, F_l, F_int):
    ks = jax.random.split(key, 8)
    f32 = jnp.float32
    return {
        "wg": 0.2 * jax.random.normal(ks[0], (F_int, F_g), f32),
        "bg": 0.1 * jax.random.normal(ks[1], (F_int,), f32),
        "wx": 0.2 * jax.random.normal(ks[2], (F_int, F_l), f32),
        "bx": 0.1 * jax.random.normal(ks[3], (F_int,), f32),
        "wp": 0.2 * jax.random.normal(ks[4], (1, F_int), f32),   # psi: 1 out ch
        "bp": 0.1 * jax.random.normal(ks[5], (1,), f32),
        "bn_g_gamma": 1.0 + 0.1 * jax.random.normal(ks[6], (F_int,), f32),
        "bn_g_beta": 0.05 * jnp.arange(F_int, dtype=f32),
        "bn_g_mean": 0.02 * jnp.arange(F_int, dtype=f32),
        "bn_g_var": jnp.ones((F_int,), f32) * 0.9,
        "bn_x_gamma": 1.0 + 0.1 * jax.random.normal(ks[7], (F_int,), f32),
        "bn_x_beta": -0.03 * jnp.arange(F_int, dtype=f32),
        "bn_x_mean": 0.01 * jnp.arange(F_int, dtype=f32),
        "bn_x_var": jnp.ones((F_int,), f32) * 1.1,
        "bn_p_gamma": jnp.array([1.2], f32),
        "bn_p_beta": jnp.array([0.1], f32),
        "bn_p_mean": jnp.array([0.05], f32),
        "bn_p_var": jnp.array([0.8], f32),
    }


if __name__ == "__main__":
    F_g, F_l, F_int = 8, 4, 16
    N, H, W = 2, 16, 16

    key = jax.random.PRNGKey(0)
    kg, kx, kp, kr = jax.random.split(key, 4)
    g = jax.random.normal(kg, (N, F_g, H, W), jnp.float32)
    x = jax.random.normal(kx, (N, F_l, H, W), jnp.float32)
    params = make_params(kp, F_g, F_l, F_int)

    ref = _reference(g, x, params)

    # f32 compute path (MXU default-precision tolerance).
    out_f32 = jax.block_until_ready(
        attention_block(g, x, params, compute_dtype=jnp.float32))
    assert out_f32.shape == (N, F_l, H, W)
    err = float(jnp.max(jnp.abs(out_f32 - ref)))
    assert err < 1e-2, f"f32 mismatch: max abs err {err}"

    # bf16 compute path (default / production): relaxed tolerance, f32 accum,
    # native-dtype x used for the final gating multiply.
    out_bf16 = jax.block_until_ready(attention_block(g, x, params))
    assert out_bf16.shape == (N, F_l, H, W)
    err = float(jnp.max(jnp.abs(out_bf16 - ref)))
    assert err < 7.5e-2, f"bf16 mismatch: max abs err {err}"

    # Ragged spatial extent (S not a multiple of 128) with N == 1: exercises
    # the cdiv grid + masked last block and the >=2-spatial-tile policy.
    Hr, Wr = 9, 15
    gr = jax.random.normal(kr, (1, F_g, Hr, Wr), jnp.float32)
    xr = jax.random.normal(jax.random.fold_in(kr, 1), (1, F_l, Hr, Wr),
                           jnp.float32)
    ref_r = _reference(gr, xr, params)
    out_r = jax.block_until_ready(attention_block(gr, xr, params))
    assert out_r.shape == (1, F_l, Hr, Wr)
    err = float(jnp.max(jnp.abs(out_r - ref_r)))
    assert err < 7.5e-2, f"ragged mismatch: max abs err {err}"

    print("KERNEL_OK")
</pallas_src>

<mosaic_0001>
module attributes {stable_mosaic.version = 11 : i64} {
  func.func @_attention_block_kernel(%arg0: i32, %arg1: i32, %arg2: memref<1x8x256xf32, #tpu.memory_space<vmem>>, %arg3: memref<1x4x256xf32, #tpu.memory_space<vmem>>, %arg4: memref<16x8xf32, #tpu.memory_space<vmem>>, %arg5: memref<16x4xf32, #tpu.memory_space<vmem>>, %arg6: memref<16x1xf32, #tpu.memory_space<vmem>>, %arg7: memref<16x1xf32, #tpu.memory_space<vmem>>, %arg8: memref<1xf32, #tpu.memory_space<smem>>, %arg9: memref<1x4x256xf32, #tpu.memory_space<vmem>>) attributes {dimension_semantics = [#tpu.dimension_semantics<parallel>, #tpu.dimension_semantics<parallel>], iteration_bounds = array<i64: 2, 1>, scalar_prefetch = 0 : i64, scratch_operands = 0 : i64, tpu.core_type = #tpu.core_type<tc>, window_params = [{transform_indices = @transform_0, window_bounds = array<i64: 1, 8, 256>}, {transform_indices = @transform_1, window_bounds = array<i64: 1, 4, 256>}, {pipeline_mode = #tpu.pipeline_mode<synchronous>, transform_indices = @transform_2, window_bounds = array<i64: 16, 8>}, {pipeline_mode = #tpu.pipeline_mode<synchronous>, transform_indices = @transform_3, window_bounds = array<i64: 16, 4>}, {pipeline_mode = #tpu.pipeline_mode<synchronous>, transform_indices = @transform_4, window_bounds = array<i64: 16, 1>}, {pipeline_mode = #tpu.pipeline_mode<synchronous>, transform_indices = @transform_5, window_bounds = array<i64: 16, 1>}, {transform_indices = @transform_6, window_bounds = array<i64: 1>}, {transform_indices = @transform_7, window_bounds = array<i64: 1, 4, 256>}]} {
    %c0 = arith.constant 0 : index
    %c0_0 = arith.constant 0 : index
    %c0_1 = arith.constant 0 : index
    %0 = vector.load %arg2[%c0, %c0_0, %c0_1] : memref<1x8x256xf32, #tpu.memory_space<vmem>>, vector<1x8x256xf32>
    %1 = vector.shape_cast %0 : vector<1x8x256xf32> to vector<8x256xf32>
    %c0_2 = arith.constant 0 : index
    %c0_3 = arith.constant 0 : index
    %c0_4 = arith.constant 0 : index
    %2 = vector.load %arg3[%c0_2, %c0_3, %c0_4] : memref<1x4x256xf32, #tpu.memory_space<vmem>>, vector<1x4x256xf32>
    %3 = vector.shape_cast %2 : vector<1x4x256xf32> to vector<4x256xf32>
    %c0_5 = arith.constant 0 : index
    %c0_6 = arith.constant 0 : index
    %4 = vector.load %arg4[%c0_5, %c0_6] : memref<16x8xf32, #tpu.memory_space<vmem>>, vector<16x8xf32>
    %cst = arith.constant dense<0.000000e+00> : vector<16x256xf32>
    %5 = tpu.matmul %4, %1, %cst {dimension_numbers = #tpu.dot_dimension_numbers<[1], [0], [0], [1], [0, 0, 1, 1], [], []>} : vector<16x8xf32>, vector<8x256xf32>, vector<16x256xf32> -> vector<16x256xf32>
    %c0_7 = arith.constant 0 : index
    %c0_8 = arith.constant 0 : index
    %6 = vector.load %arg5[%c0_7, %c0_8] : memref<16x4xf32, #tpu.memory_space<vmem>>, vector<16x4xf32>
    %cst_9 = arith.constant dense<0.000000e+00> : vector<16x256xf32>
    %7 = tpu.matmul %6, %3, %cst_9 {dimension_numbers = #tpu.dot_dimension_numbers<[1], [0], [0], [1], [0, 0, 1, 1], [], []>} : vector<16x4xf32>, vector<4x256xf32>, vector<16x256xf32> -> vector<16x256xf32>
    %8 = arith.addf %5, %7 : vector<16x256xf32>
    %c0_10 = arith.constant 0 : index
    %c0_11 = arith.constant 0 : index
    %9 = vector.load %arg6[%c0_10, %c0_11] : memref<16x1xf32, #tpu.memory_space<vmem>>, vector<16x1xf32>
    %10 = vector.broadcast %9 : vector<16x1xf32> to vector<16x256xf32>
    %11 = arith.addf %8, %10 : vector<16x256xf32>
    %cst_12 = arith.constant 0.000000e+00 : f32
    %12 = vector.broadcast %cst_12 : f32 to vector<16x256xf32>
    %13 = arith.maximumf %11, %12 : vector<16x256xf32>
    %c0_13 = arith.constant 0 : index
    %c0_14 = arith.constant 0 : index
    %14 = vector.load %arg7[%c0_13, %c0_14] : memref<16x1xf32, #tpu.memory_space<vmem>>, vector<16x1xf32>
    %15 = vector.broadcast %14 : vector<16x1xf32> to vector<16x256xf32>
    %16 = arith.mulf %13, %15 : vector<16x256xf32>
    %cst_15 = arith.constant dense<0.000000e+00> : vector<256xf32>
    %17 = vector.multi_reduction <add>, %16, %cst_15 [0] : vector<16x256xf32> to vector<256xf32>
    %18 = vector.shape_cast %17 : vector<256xf32> to vector<1x256xf32>
    %c0_16 = arith.constant 0 : index
    %19 = memref.load %arg8[%c0_16] : memref<1xf32, #tpu.memory_space<smem>>
    %20 = vector.broadcast %19 : f32 to vector<1x256xf32>
    %21 = arith.addf %18, %20 : vector<1x256xf32>
    %22 = arith.negf %21 : vector<1x256xf32>
    %23 = math.exp %22 : vector<1x256xf32>
    %cst_17 = arith.constant 1.000000e+00 : f32
    %24 = vector.broadcast %cst_17 : f32 to vector<1x256xf32>
    %25 = arith.addf %24, %23 : vector<1x256xf32>
    %26 = arith.divf %24, %25 : vector<1x256xf32>
    %27 = vector.broadcast %26 : vector<1x256xf32> to vector<4x256xf32>
    %28 = arith.mulf %3, %27 : vector<4x256xf32>
    %c0_18 = arith.constant 0 : index
    %c0_19 = arith.constant 0 : index
    %c0_20 = arith.constant 0 : index
    %29 = vector.load %arg9[%c0_18, %c0_19, %c0_20] : memref<1x4x256xf32, #tpu.memory_space<vmem>>, vector<1x4x256xf32>
    %30 = vector.shape_cast %29 : vector<1x4x256xf32> to vector<4x256xf32>
    %31 = vector.shape_cast %28 : vector<4x256xf32> to vector<1x4x256xf32>
    tpu.vector_store %arg9[%c0_18, %c0_19, %c0_20], %31 {strides = array<i32>} : memref<1x4x256xf32, #tpu.memory_space<vmem>>, vector<1x4x256xf32>,
    return
  }
  func.func @transform_0(%arg0: i32, %arg1: i32) -> (i32, i32, i32) {
    %c0_i32 = arith.constant 0 : i32
    %c0_i32_0 = arith.constant 0 : i32
    return %arg0, %c0_i32, %arg1 : i32, i32, i32
  }
  func.func @transform_1(%arg0: i32, %arg1: i32) -> (i32, i32, i32) {
    %c0_i32 = arith.constant 0 : i32
    %c0_i32_0 = arith.constant 0 : i32
    return %arg0, %c0_i32, %arg1 : i32, i32, i32
  }
  func.func @transform_2(%arg0: i32, %arg1: i32) -> (i32, i32) {
    %c0_i32 = arith.constant 0 : i32
    %c0_i32_0 = arith.constant 0 : i32
    %c0_i32_1 = arith.constant 0 : i32
    return %c0_i32, %c0_i32_0 : i32, i32
  }
  func.func @transform_3(%arg0: i32, %arg1: i32) -> (i32, i32) {
    %c0_i32 = arith.constant 0 : i32
    %c0_i32_0 = arith.constant 0 : i32
    %c0_i32_1 = arith.constant 0 : i32
    return %c0_i32, %c0_i32_0 : i32, i32
  }
  func.func @transform_4(%arg0: i32, %arg1: i32) -> (i32, i32) {
    %c0_i32 = arith.constant 0 : i32
    %c0_i32_0 = arith.constant 0 : i32
    %c0_i32_1 = arith.constant 0 : i32
    return %c0_i32, %c0_i32_0 : i32, i32
  }
  func.func @transform_5(%arg0: i32, %arg1: i32) -> (i32, i32) {
    %c0_i32 = arith.constant 0 : i32
    %c0_i32_0 = arith.constant 0 : i32
    %c0_i32_1 = arith.constant 0 : i32
    return %c0_i32, %c0_i32_0 : i32, i32
  }
  func.func @transform_6(%arg0: i32, %arg1: i32) -> i32 {
    %c0_i32 = arith.constant 0 : i32
    %c0_i32_0 = arith.constant 0 : i32
    return %c0_i32 : i32
  }
  func.func @transform_7(%arg0: i32, %arg1: i32) -> (i32, i32, i32) {
    %c0_i32 = arith.constant 0 : i32
    %c0_i32_0 = arith.constant 0 : i32
    return %arg0, %c0_i32, %arg1 : i32, i32, i32
  }
}

</mosaic_0001>

<bundles_post_ra>
// kernel: tpu_custom_call.1
= control target key start
LH: loop header
LB: loop body
LE: loop exit
PB: predicated region body
PF: predicated region fallthrough
CT: control target
= control target key end

     0   :  { %s1047_s0 = inlined_call_operand.vmem [shape: f32[2,8,256], index: 0, kind: input, shape index: {}]   ;;  %s1048_s1 = inlined_call_operand.vmem [shape: f32[2,4,256], index: 1, kind: input, shape index: {}]   ;;  %s1049_s2 = inlined_call_operand.vmem [shape: f32[16,8], index: 2, kind: input, shape index: {}]   ;;  %s1050_s3 = inlined_call_operand.vmem [shape: f32[16,4], index: 3, kind: input, shape index: {}]   ;;  %s1051_s4 = inlined_call_operand.vmem [shape: f32[16,1], index: 4, kind: input, shape index: {}]   ;;  %s1052_s5 = inlined_call_operand.vmem [shape: f32[16,1], index: 5, kind: input, shape index: {}]   ;;  %s1053_s6 = inlined_call_operand.<no memory space> [shape: f32[1], index: 6, kind: input, shape index: {}]   ;;  %s1054_s7 = inlined_call_operand.hbm [shape: f32[2,4,256], index: 7, kind: output, shape index: {}]  }
   0x1   :  { %12 = sst [smem:[#allocation2]] %s1053_s6 }
   0x2   :  { %13 = vsyncpa [#allocation4], 0 }
   0x3   :  { %15 = vsyncpa [#allocation4 + $0x1], 0  ;;  %s899_s26 = smov 0   ;;  %s901_s27 = smov 0  }
   0x4   :  { %s903_s28 = smov 0   ;;  %s905_s29 = smov 0  }
   0x5   :  { %s907_s30 = smov 0   ;;  %s909_s8 = smov 0  }
   0x6 LB: > { %s679_s6 = sadd.s32 4294967295, %s853_s8   ;;  %s680_s9 = sadd.s32 4294967294, %s853_s8   ;;  %s853_s8 = sphi %s909_s8, %s21_s8   ;;  %s849_s30 = sphi %s907_s30, %s1063_s30   ;;  %s845_s29 = sphi %s905_s29, %s1062_s29   ;;  %s841_s28 = sphi %s903_s28, %s1061_s28   ;;  %s837_s27 = sphi %s901_s27, %s1060_s27   ;;  %s833_s26 = sphi %s899_s26, %s1059_s26  }
   0x7   : > { %s33_s10 = sadd.s32 1, %s849_s30  ;;  %s203_s11 = sadd.s32 1, %s841_s28 }
   0x8   : > { %p35_p0 = scmp.ge.s32.totalorder %s33_s10, 2  ;;  %p213_p1 = scmp.ne.s32.totalorder %s841_s28, %s837_s27 }
   0x9   : > { %p214_p2 = scmp.eq.s32.totalorder %s679_s6, 1  ;;  %p219_p3 = scmp.ne.s32.totalorder %s837_s27, %s833_s26 }
   0xa   : > { %s1065_s10 = smov (%p35_p0, %s33_s10), 0  ;;  %p220_p5 = scmp.eq.s32.totalorder %s680_s9, 1 }
   0xb   : > { %p939_p4 = por %p214_p2, %p213_p1  ;;  %s198_s13 = ssub.s32 %s849_s30, %s1065_s10 }
   0xc   : > { %p683_p6 = scmp.ge.s32.totalorder %s853_s8, 1  ;;  %p201_p7 = scmp.eq.s32.totalorder %s198_s13, 0 }
   0xd   : > { %p946_p8 = por %p220_p5, %p219_p3  ;;  %p279_p9 = scmp.lt.s32.totalorder %s853_s8, 3 }
   0xe   : > { %s952_s15 = scalar_select %p201_p7, %s841_s28, %s203_s11  }
   0xf   : > { %p280_p10 = pnand %p683_p6, %p279_p9 }
  0x10   : > { %p325_p11 = scmp.lt.s32.totalorder (!%p280_p10), %s845_s29, 1  ;;  %s517_s9 = sld [smem:[#allocation2]] (!%p280_p10) }
  0x11   : > { %283 = sbr.rel (%p280_p10) target bundleno = 232 (0xe8), region = 48  ;;  %s708_s16 = sshll.u32 (!%p280_p10), %s845_s29, 3 }
  0x12   : > { %s580_s19 = scalar_lea.hbm (!%p280_p10), %s1054_s7, %s708_s16 }
  0x16   : > { %v467_v0 = vld [vmem:[%s1051_s4] sm:$0xff]  ;;  %s326_s18 = scalar_select %p325_p11, %s845_s29, 1  ;;  %v855_v1 = vmov 0   ;;  %vm414_vm0 = vcmask 64512   ;;  %v468_v7 = vld [vmem:[%s1051_s4 + $0x8] sm:$0xff]  ;;  %vm363_vm1 = vcmask 1043456   ;;  %v518_v54 = vstv %s517_s9 }
  0x17   : > { %765 = vset.pattern.permute.xlu0 %v855_v1  ;;  %766 = vset.pattern.permute.xlu1 %v855_v1  ;;  %v487_v2 = vld [vmem:[%s1052_s5] sm:$0xff]  ;;  %v488_v8 = vld [vmem:[%s1052_s5 + $0x8] sm:$0xff]  ;;  %vm356_vm2 = vcmask 31744   ;;  %s795_s9 = scalar_lea.hbm %s1054_s7, 16 }
  0x18   : > { %471 = vperm.xlu0 %765, %v467_v0   ;;  %491 = vperm.xlu1 %766, %v487_v2   ;;  %s706_s21 = sshll.u32 %s326_s18, 4  ;;  %s707_s22 = sshll.u32 %s326_s18, 3  ;;  %v348_v3 = vld [vmem:[%s1049_s2] sm:$0xff]  ;;  %v349_v10 = vld [vmem:[%s1049_s2 + $0x8] sm:$0xff] }
  0x19   : > { %s332_s25 = scalar_lea.vmem %s1047_s0, %s706_s21  ;;  %s342_s11 = scalar_lea.vmem %s1048_s1, %s707_s22  ;;  %v350_v9 = vld [vmem:[%s1050_s3] sm:$0xff]  ;;  %v351_v13 = vld [vmem:[%s1050_s3 + $0x8] sm:$0xff] }
  0x1a   : > { %v345_v4 = vld [vmem:[%s332_s25] sm:$0xff]  ;;  %v346_v6 = vld [vmem:[%s332_s25 + $0x8] sm:$0xff]  ;;  %s584_s21 = sshll.u32 %s580_s19, 4  ;;  %s585_s21 = int_to_ptr.hbm [resolvable:$true] %s584_s21 }
  0x1b   : > { %v971_v5 = vld [vmem:[%s342_s11] sm:$0xff]  ;;  %436 = vmatpush.msra.mxu2 %v345_v4  ;;  %459 = vmatpush.msra.mxu3 %v346_v6  ;;  %s321_s11 = sand.u32 1, %s837_s27   ;;  %s789_s23 = sshra.s32 %s585_s21, 4  ;;  %s790_s23 = int_to_ptr.hbm [resolvable:$true] %s789_s23 }
  0x1c   : > { %353 = vst [vmem:[#allocation1] ss:$2 sm:$0xff] %v971_v5  ;;  %695 = vmatmul.msk.f32.vlgmr.msra.gmra.mxu2 %vm414_vm0, %v348_v3  ;;  %697 = vmatmul.msk.f32.vlgmr.msra.gmra.mxu3 %vm414_vm0, %v348_v3  ;;  %s998_s13 = sshll.u32 %s321_s11, 3  ;;  %s567_s22 = scalar_lea.sflag [#allocation4], %s321_s11 }
  0x1d   : > { %s323_s29 = scalar_lea.vmem [#allocation3], %s998_s13  ;;  %s791_s24 = scalar_lea.hbm %s790_s23, 8 }
  0x1e   : > { %s582_s20 = sshll.u32 %s323_s29, 4  ;;  %p792_p12 = scmp.ne.s32.totalorder %s790_s23, %s791_s24  ;;  %s583_s20 = int_to_ptr.vmem [resolvable:$true] %s582_s20 }
  0x1f   : > { %p796_p1 = scmp.lt.s32.totalorder %s790_s23, %s1054_s7  ;;  %p797_p2 = scmp.lt.s32.totalorder %s795_s9, %s791_s24 }
  0x20   : > { %476 = vperm.xlu0 %765, %v468_v7   ;;  %496 = vperm.xlu1 %766, %v488_v8   ;;  %p793_p13 = pnand %p792_p12, %p939_p4 }
  0x21   : > { %p798_p3 = por %p797_p2, %p796_p1 }
  0x22   : > { %p794_p0 = pneg %p793_p13 }
  0x23   : > { %v354_v11 = vld.sshfl [vmem:[#allocation1] sm:$0xff pattern:$0x75316420]  ;;  %v355_v12 = vld.sshfl [vmem:[#allocation1 + $0x8] sm:$0xff pattern:$0x75316420] }
  0x24   : > { %689 = vmatpush.msk.msra.mxu0 %vm363_vm1, %v354_v11  ;;  %692 = vmatpush.msk.msra.mxu1 %vm363_vm1, %v355_v12  ;;  %p799_p5 = pnand %p798_p3, %p794_p0 }
  0x25   : > { %690 = vmatmul.msk.f32.vlgmr.msra.gmra.mxu0 %vm356_vm2, %v350_v9  ;;  %693 = vmatmul.msk.f32.vlgmr.msra.gmra.mxu1 %vm356_vm2, %v350_v9 }
  0x26   : > { %696 = vmatmul.msk.f32.gmra.mxu2 %vm414_vm0, %v349_v10  ;;  %698 = vmatmul.msk.f32.gmra.mxu3 %vm414_vm0, %v349_v10 }
  0x2d   : > { %691 = vmatmul.msk.f32.gmra.mxu0 %vm356_vm2, %v351_v13  ;;  %694 = vmatmul.msk.f32.gmra.mxu1 %vm356_vm2, %v351_v13 }
  0x8a   : > { %v472_v16 = vpop.permute.xlu0 %471  ;;  %v492_v21 = vpop.permute.xlu1 %491 }
  0x92   : > { %v477_v30 = vpop.permute.xlu0 %476  ;;  %v497_v37 = vpop.permute.xlu1 %496 }
  0x9f   : > { %v438_v14 = vpop.f32.mrf.mxu2  ;;  %v461_v15 = vpop.f32.mrf.mxu3 }
  0xa2   : > { %v385_v17 = vpop.f32.mrf.mxu0  ;;  %v408_v18 = vpop.f32.mrf.mxu1 }
  0xa3   : > { %v439_v19 = vadd.f32 %v438_v14, %v385_v17  ;;  %v462_v20 = vadd.f32 %v461_v15, %v408_v18 }
  0xa5   : > { %v479_v22 = vadd.f32 %v472_v16, %v439_v19  ;;  %v480_v23 = vadd.f32 %v472_v16, %v462_v20 }
  0xa7   : > { %v483_v31 = vmax.f32 %v479_v22, 0.0  ;;  %v484_v32 = vmax.f32 %v480_v23, 0.0 }
  0xa9   : > { %v441_v24 = vpop.f32.mrf.mxu2  ;;  %v464_v25 = vpop.f32.mrf.mxu3  ;;  %v499_v38 = vmul.f32 %v492_v21, %v483_v31  ;;  %v500_v39 = vmul.f32 %v492_v21, %v484_v32 }
  0xaa   : > { %v388_v26 = vpop.f32.mrf.mxu0  ;;  %v411_v27 = vpop.f32.mrf.mxu1 }
  0xab   : > { %v442_v28 = vadd.f32 %v441_v24, %v388_v26  ;;  %v465_v29 = vadd.f32 %v464_v25, %v411_v27 }
  0xad   : > { %v481_v33 = vadd.f32 %v477_v30, %v442_v28  ;;  %v482_v34 = vadd.f32 %v477_v30, %v465_v29 }
  0xaf   : > { %v485_v35 = vmax.f32 %v481_v33, 0.0  ;;  %v486_v36 = vmax.f32 %v482_v34, 0.0 }
  0xb1   : > { %v501_v40 = vmul.f32 %v497_v37, %v485_v35  ;;  %v502_v41 = vmul.f32 %v497_v37, %v486_v36 }
  0xb3   : > { %v503_v42 = vadd.f32 %v501_v40, %v499_v38  ;;  %v510_v43 = vadd.f32 %v502_v41, %v500_v39 }
  0xb5   : > { %v504_v44 = vrot.slane %v503_v42, 4  ;;  %v511_v45 = vrot.slane %v510_v43, 4 }
  0xb7   : > { %v505_v46 = vadd.f32 %v504_v44, %v503_v42  ;;  %v512_v47 = vadd.f32 %v511_v45, %v510_v43 }
  0xb9   : > { %v506_v48 = vrot.slane %v505_v46, 2  ;;  %v513_v49 = vrot.slane %v512_v47, 2 }
  0xbb   : > { %v507_v50 = vadd.f32 %v506_v48, %v505_v46  ;;  %v514_v51 = vadd.f32 %v513_v49, %v512_v47 }
  0xbd   : > { %v508_v52 = vrot.slane %v507_v50, 1  ;;  %v515_v53 = vrot.slane %v514_v51, 1 }
  0xbf   : > { %v509_v55 = vadd.f32 %v508_v52, %v507_v50  ;;  %v516_v56 = vadd.f32 %v515_v53, %v514_v51 }
  0xc1   : > { %v519_v57 = vadd.f32 %v518_v54, %v509_v55  ;;  %v520_v58 = vadd.f32 %v518_v54, %v516_v56 }
  0xc3   : > { %v699_v59 = vmul.f32 -1.442695, %v519_v57  ;;  %v700_v60 = vmul.f32 -1.442695, %v520_v58 }
  0xc5   : > { %767 = vpow2.f32 %v699_v59 }
  0xc6   : > { %769 = vpow2.f32 %v700_v60 }
  0xcb   : > { %v768_v61 = vpop.eup %767 }
  0xcc   : > { %v770_v62 = vpop.eup %769  ;;  %v527_v63 = vadd.f32 1.0, %v768_v61 }
  0xcd   : > { %v528_v0 = vadd.f32 1.0, %v770_v62 }
  0xce   : > { %771 = vrcp.f32 %v527_v63  ;;  %vm534_vm5 = vweird.f32 %v527_v63  ;;  %v540_v13 = vand.u32 2147483648, %v527_v63  ;;  %v538_v15 = vand.u32 2147483647, %v527_v63 }
  0xcf   : > { %773 = vrcp.f32 %v528_v0  ;;  %v555_v9 = vand.u32 2147483648, %v528_v0  ;;  %v553_v11 = vand.u32 2147483647, %v528_v0  ;;  %vm549_vm7 = vweird.f32 %v528_v0 }
  0xd0   : > { %v541_v20 = vor.u32 1.1754944e-38, %v540_v13  ;;  %vm539_vm10 = vcmp.eq.f32.partialorder %v538_v15, 8.507059e+37 }
  0xd1   : > { %v556_v17 = vor.u32 1.1754944e-38, %v555_v9  ;;  %vm554_vm9 = vcmp.eq.f32.partialorder %v553_v11, 8.507059e+37 }
  0xd4   : > { %v772_v1 = vpop.eup %771 }
  0xd5   : > { %v774_v2 = vpop.eup %773  ;;  %v530_v3 = vmul.f32 %v772_v1, %v527_v63  ;;  %vm535_vm3 = vweird.f32 %v772_v1 }
  0xd6   : > { %v545_v4 = vmul.f32 %v774_v2, %v528_v0  ;;  %vm550_vm4 = vweird.f32 %v774_v2  ;;  %vm1001_vm6 = vmor %vm534_vm5, %vm535_vm3 }
  0xd7   : > { %v531_v6 = vsub.f32 1.0, %v530_v3  ;;  %vm551_vm8 = vmor %vm549_vm7, %vm550_vm4 }
  0xd8   : > { %v546_v7 = vsub.f32 1.0, %v545_v4 }
  0xd9   : > { %v532_v8 = vmul.f32 %v772_v1, %v531_v6 }
  0xda   : > { %v547_v10 = vmul.f32 %v774_v2, %v546_v7 }
  0xdb   : > { %v533_v12 = vadd.f32 %v772_v1, %v532_v8 }
  0xdc   : > { %v548_v16 = vadd.f32 %v774_v2, %v547_v10 }
  0xdd   : > { %v537_v18 = vsel %vm1001_vm6, %v772_v1, %v533_v12 }
  0xde   : > { %v552_v19 = vsel %vm551_vm8, %v774_v2, %v548_v16  ;;  %v542_v23 = vsel %vm539_vm10, %v541_v20, %v537_v18 }
  0xdf   : > { %v557_v21 = vsel %vm554_vm9, %v556_v17, %v552_v19 }
  0xe0   : > { %v561_v22 = vrot.slane %v557_v21, 4 }
  0xe2   : > { %v562_v24 = vsel %vm363_vm1, %v542_v23, %v561_v22 }
  0xe3   : > { %v564_v25 = vmul.f32 %v562_v24, %v971_v5 }
  0xe5   : > { %565 = vst [vmem:[%s323_s29] sm:$0xff] %v564_v25 }
  0xe6   : > { %802 = shalt.err (!%p799_p5)
}
  0xe7   : > { %709 = dma.vmem_to_hbm [thread:$0]  (%p939_p4), %s583_s20, 128, %s585_s21, %s567_s22  }
  0xe8 PF: > { %p715_p6 = scmp.ge.s32.totalorder %s853_s8, 2  ;;  %s596_s11 = sand.u32 1, %s833_s26  }
  0xe9   : > { %s597_s17 = scalar_lea.sflag [#allocation4], %s596_s11 }
  0xea   : > { %p712_p7 = pnand %p715_p6, %p946_p8 }
  0xec   : > { %p713_p9 = pneg %p712_p7 }
  0xee   : > { %828 = dma.done.wait (%p713_p9), %s597_s17, 128  }
  0xef   : > { %830 = vsyncadd (%p713_p9), %s597_s17, 4294967168  ;;  %s21_s8 = sadd.s32 1, %s853_s8   ;;  %s1059_s26 = smov %s837_s27 }
  0xf0   : > { %p18_p10 = scmp.ge.s32.totalorder %s21_s8, 4   ;;  %s1060_s27 = smov %s841_s28 }
  0xf1   : > { %s1061_s28 = smov %s952_s15  ;;  %s1062_s29 = smov %s849_s30 }
  0xf2   : > { %s1063_s30 = smov %s1065_s10  ;;  %20 = sbr.rel (!%p18_p10) target bundleno = 6 (0x6), region = 86 }
  0xf7   :  { %603 = vsyncpa [#allocation4], 1 }
  0xf8   :  { %605 = vsyncpa [#allocation4 + $0x1], 1 }

</bundles_post_ra>
